<compile_context>
chip_gen: v7x
topology: tpu7x:2x2x1
jax: 0.10.0
libtpu: 0.0.40
codegen_flags: <defaults>
</compile_context>

<pallas_src>
import functools

import jax
import jax.numpy as jnp
from jax.experimental import pallas as pl
from jax.experimental.pallas import tpu as pltpu


def _round_up(x, m):
    return ((x + m - 1) // m) * m


def actor_kernel(state_ref, w1_ref, b1_ref, w2_ref, b2_ref, wh_ref, bh_ref,
                 out_ref, *, n_actions):
    # fc1 + relu
    x = state_ref[...]
    h1 = jnp.dot(x, w1_ref[...], preferred_element_type=jnp.float32) + b1_ref[...]
    h1 = jnp.maximum(h1, 0.0)
    # fc2 + relu
    h2 = jnp.dot(h1, w2_ref[...], preferred_element_type=jnp.float32) + b2_ref[...]
    h2 = jnp.maximum(h2, 0.0)
    # fused heads: one matmul producing [mu | sigma] lane-packed
    heads = jnp.dot(h2, wh_ref[...], preferred_element_type=jnp.float32) + bh_ref[...]
    # clamp only the sigma half (columns >= n_actions) to [1e-6, 1]
    col = jax.lax.broadcasted_iota(jnp.int32, heads.shape, dimension=1)
    clipped = jnp.clip(heads, 1e-6, 1.0)
    out = jnp.where(col >= n_actions, clipped, heads)
    out_ref[...] = out.astype(out_ref.dtype)


def actor_forward(state, params, *, block_b=512):
    """Pallas-TPU implementation of ActorNetwork.forward -> (mu, sigma)."""
    (w1, b1, w2, b2, wmu, bmu, wsig, bsig) = params
    B, D = state.shape
    H1 = w1.shape[1]
    H2 = w2.shape[1]
    A = wmu.shape[1]

    # Pack the two heads into one [H2, 2*A] matmul / one lane-packed output.
    wh = jnp.concatenate([wmu, wsig], axis=1)   # [H2, 2A]
    bh = jnp.concatenate([bmu, bsig], axis=1)   # [1, 2A]

    # Batch tiling: sublane-aligned tile, grid over batch, weights resident.
    bb = min(block_b, _round_up(B, 8))
    B_pad = _round_up(B, bb)
    state_p = state if B_pad == B else jnp.pad(state, ((0, B_pad - B), (0, 0)))
    grid = (B_pad // bb,)

    act_spec = pl.BlockSpec((bb, D), lambda i: (i, 0))
    out_spec = pl.BlockSpec((bb, 2 * A), lambda i: (i, 0))

    def resident(arr):
        # Whole-array block, same block index every grid step -> DMA'd once.
        return pl.BlockSpec(arr.shape, lambda i: (0, 0))

    param_elems = w1.size + b1.size + w2.size + b2.size + wh.size + bh.size
    flops = 2 * B_pad * (D * H1 + H1 * H2 + H2 * 2 * A)
    bytes_accessed = 4 * (B_pad * (D + 2 * A) + param_elems)

    out = pl.pallas_call(
        functools.partial(actor_kernel, n_actions=A),
        out_shape=jax.ShapeDtypeStruct((B_pad, 2 * A), jnp.float32),
        grid=grid,
        in_specs=[
            act_spec,
            resident(w1), resident(b1),
            resident(w2), resident(b2),
            resident(wh), resident(bh),
        ],
        out_specs=out_spec,
        compiler_params=pltpu.CompilerParams(
            dimension_semantics=("parallel",),  # shards batch across TCs on v7x
        ),
        cost_estimate=pl.CostEstimate(
            flops=flops, transcendentals=0, bytes_accessed=bytes_accessed),
    )(state_p, w1, b1, w2, b2, wh, bh)

    mu = out[:B, :A]
    sigma = out[:B, A:2 * A]
    return mu, sigma


def init_linear_params(key, fan_in, fan_out):
    """Deterministic init matching nn.Linear default: U(-1/sqrt(fan_in), +)."""
    kw, kb = jax.random.split(key)
    bound = 1.0 / jnp.sqrt(jnp.float32(fan_in))
    # stored as [in, out] (transposed vs PyTorch weight layout)
    w = jax.random.uniform(kw, (fan_in, fan_out), jnp.float32, -bound, bound)
    b = jax.random.uniform(kb, (1, fan_out), jnp.float32, -bound, bound)
    return w, b


def make_actor_params(key, input_dim, fc1_dims, fc2_dims, n_actions):
    k1, k2, k3, k4 = jax.random.split(key, 4)
    w1, b1 = init_linear_params(k1, input_dim, fc1_dims)
    w2, b2 = init_linear_params(k2, fc1_dims, fc2_dims)
    wmu, bmu = init_linear_params(k3, fc2_dims, n_actions)
    wsig, bsig = init_linear_params(k4, fc2_dims, n_actions)
    return (w1, b1, w2, b2, wmu, bmu, wsig, bsig)


def actor_forward_ref(state, params):
    """Pure-JAX reference for correctness checking."""
    (w1, b1, w2, b2, wmu, bmu, wsig, bsig) = params
    h1 = jnp.maximum(state @ w1 + b1, 0.0)
    h2 = jnp.maximum(h1 @ w2 + b2, 0.0)
    mu = h2 @ wmu + bmu
    sigma = jnp.clip(h2 @ wsig + bsig, 1e-6, 1.0)
    return mu, sigma


if __name__ == "__main__":
    # Shapes consistent with the module: input_dims=(8,), fc1=fc2=256, n_actions=2.
    B, D, H1, H2, A = 4, 8, 256, 256, 2

    key = jax.random.PRNGKey(0)
    k_params, k_state = jax.random.split(key)

    params = make_actor_params(k_params, D, H1, H2, A)
    state = jax.random.normal(k_state, (B, D), dtype=jnp.float32)

    mu, sigma = actor_forward(state, params)
    jax.block_until_ready((mu, sigma))

    mu_ref, sigma_ref = actor_forward_ref(state, params)
    assert mu.shape == (B, A) and sigma.shape == (B, A)
    assert jnp.allclose(mu, mu_ref, atol=1e-3, rtol=1e-3)
    assert jnp.allclose(sigma, sigma_ref, atol=1e-3, rtol=1e-3)
    # Compare in float32: clamped values equal float32(1e-6), which is slightly
    # below the Python double 1e-6 (this caused the previous assertion failure).
    assert bool(jnp.all(sigma >= jnp.float32(1e-6)))
    assert bool(jnp.all(sigma <= jnp.float32(1.0)))

    print("KERNEL_OK")
</pallas_src>

<mosaic_0001>
module attributes {stable_mosaic.version = 11 : i64} {
  func.func @actor_kernel(%arg0: i32, %arg1: memref<8x8xf32, #tpu.memory_space<vmem>>, %arg2: memref<8x256xf32, #tpu.memory_space<vmem>>, %arg3: memref<1x256xf32, #tpu.memory_space<vmem>>, %arg4: memref<256x256xf32, #tpu.memory_space<vmem>>, %arg5: memref<1x256xf32, #tpu.memory_space<vmem>>, %arg6: memref<256x4xf32, #tpu.memory_space<vmem>>, %arg7: memref<1x4xf32, #tpu.memory_space<vmem>>, %arg8: memref<8x4xf32, #tpu.memory_space<vmem>>) attributes {dimension_semantics = [#tpu.dimension_semantics<parallel>], iteration_bounds = array<i64: 1>, scalar_prefetch = 0 : i64, scratch_operands = 0 : i64, tpu.core_type = #tpu.core_type<tc>, window_params = [{transform_indices = @transform_0, window_bounds = array<i64: 8, 8>}, {pipeline_mode = #tpu.pipeline_mode<synchronous>, transform_indices = @transform_1, window_bounds = array<i64: 8, 256>}, {pipeline_mode = #tpu.pipeline_mode<synchronous>, transform_indices = @transform_2, window_bounds = array<i64: 1, 256>}, {pipeline_mode = #tpu.pipeline_mode<synchronous>, transform_indices = @transform_3, window_bounds = array<i64: 256, 256>}, {pipeline_mode = #tpu.pipeline_mode<synchronous>, transform_indices = @transform_4, window_bounds = array<i64: 1, 256>}, {pipeline_mode = #tpu.pipeline_mode<synchronous>, transform_indices = @transform_5, window_bounds = array<i64: 256, 4>}, {pipeline_mode = #tpu.pipeline_mode<synchronous>, transform_indices = @transform_6, window_bounds = array<i64: 1, 4>}, {transform_indices = @transform_7, window_bounds = array<i64: 8, 4>}]} {
    %c0 = arith.constant 0 : index
    %c0_0 = arith.constant 0 : index
    %0 = vector.load %arg1[%c0, %c0_0] : memref<8x8xf32, #tpu.memory_space<vmem>>, vector<8x8xf32>
    %c0_1 = arith.constant 0 : index
    %c0_2 = arith.constant 0 : index
    %1 = vector.load %arg2[%c0_1, %c0_2] : memref<8x256xf32, #tpu.memory_space<vmem>>, vector<8x256xf32>
    %cst = arith.constant dense<0.000000e+00> : vector<8x256xf32>
    %2 = tpu.matmul %0, %1, %cst {dimension_numbers = #tpu.dot_dimension_numbers<[1], [0], [0], [1], [0, 0, 1, 1], [], []>} : vector<8x8xf32>, vector<8x256xf32>, vector<8x256xf32> -> vector<8x256xf32>
    %c0_3 = arith.constant 0 : index
    %c0_4 = arith.constant 0 : index
    %3 = vector.load %arg3[%c0_3, %c0_4] : memref<1x256xf32, #tpu.memory_space<vmem>>, vector<1x256xf32>
    %4 = vector.broadcast %3 : vector<1x256xf32> to vector<8x256xf32>
    %5 = arith.addf %2, %4 : vector<8x256xf32>
    %cst_5 = arith.constant 0.000000e+00 : f32
    %6 = vector.broadcast %cst_5 : f32 to vector<8x256xf32>
    %7 = arith.maximumf %5, %6 : vector<8x256xf32>
    %c0_6 = arith.constant 0 : index
    %c0_7 = arith.constant 0 : index
    %8 = vector.load %arg4[%c0_6, %c0_7] : memref<256x256xf32, #tpu.memory_space<vmem>>, vector<256x256xf32>
    %cst_8 = arith.constant dense<0.000000e+00> : vector<8x256xf32>
    %9 = tpu.matmul %7, %8, %cst_8 {dimension_numbers = #tpu.dot_dimension_numbers<[1], [0], [0], [1], [0, 0, 1, 1], [], []>} : vector<8x256xf32>, vector<256x256xf32>, vector<8x256xf32> -> vector<8x256xf32>
    %c0_9 = arith.constant 0 : index
    %c0_10 = arith.constant 0 : index
    %10 = vector.load %arg5[%c0_9, %c0_10] : memref<1x256xf32, #tpu.memory_space<vmem>>, vector<1x256xf32>
    %11 = vector.broadcast %10 : vector<1x256xf32> to vector<8x256xf32>
    %12 = arith.addf %9, %11 : vector<8x256xf32>
    %cst_11 = arith.constant 0.000000e+00 : f32
    %13 = vector.broadcast %cst_11 : f32 to vector<8x256xf32>
    %14 = arith.maximumf %12, %13 : vector<8x256xf32>
    %c0_12 = arith.constant 0 : index
    %c0_13 = arith.constant 0 : index
    %15 = vector.load %arg6[%c0_12, %c0_13] : memref<256x4xf32, #tpu.memory_space<vmem>>, vector<256x4xf32>
    %cst_14 = arith.constant dense<0.000000e+00> : vector<8x4xf32>
    %16 = tpu.matmul %14, %15, %cst_14 {dimension_numbers = #tpu.dot_dimension_numbers<[1], [0], [0], [1], [0, 0, 1, 1], [], []>} : vector<8x256xf32>, vector<256x4xf32>, vector<8x4xf32> -> vector<8x4xf32>
    %c0_15 = arith.constant 0 : index
    %c0_16 = arith.constant 0 : index
    %17 = vector.load %arg7[%c0_15, %c0_16] : memref<1x4xf32, #tpu.memory_space<vmem>>, vector<1x4xf32>
    %18 = vector.broadcast %17 : vector<1x4xf32> to vector<8x4xf32>
    %19 = arith.addf %16, %18 : vector<8x4xf32>
    %20 = tpu.iota {dimensions = array<i32: 1>} : vector<8x4xi32>
    %cst_17 = arith.constant 9.99999997E-7 : f32
    %cst_18 = arith.constant 1.000000e+00 : f32
    %21 = vector.broadcast %cst_17 : f32 to vector<8x4xf32>
    %22 = arith.maximumf %21, %19 : vector<8x4xf32>
    %23 = vector.broadcast %cst_18 : f32 to vector<8x4xf32>
    %24 = arith.minimumf %23, %22 : vector<8x4xf32>
    %c2_i32 = arith.constant 2 : i32
    %25 = vector.broadcast %c2_i32 : i32 to vector<8x4xi32>
    %26 = arith.cmpi sge, %20, %25 : vector<8x4xi32>
    %27 = arith.select %26, %24, %19 : vector<8x4xi1>, vector<8x4xf32>
    %c0_19 = arith.constant 0 : index
    %c0_20 = arith.constant 0 : index
    %28 = vector.load %arg8[%c0_19, %c0_20] : memref<8x4xf32, #tpu.memory_space<vmem>>, vector<8x4xf32>
    tpu.vector_store %arg8[%c0_19, %c0_20], %27 {strides = array<i32>} : memref<8x4xf32, #tpu.memory_space<vmem>>, vector<8x4xf32>,
    return
  }
  func.func @transform_0(%arg0: i32) -> (i32, i32) {
    %c0_i32 = arith.constant 0 : i32
    %c0_i32_0 = arith.constant 0 : i32
    return %arg0, %c0_i32 : i32, i32
  }
  func.func @transform_1(%arg0: i32) -> (i32, i32) {
    %c0_i32 = arith.constant 0 : i32
    %c0_i32_0 = arith.constant 0 : i32
    %c0_i32_1 = arith.constant 0 : i32
    return %c0_i32, %c0_i32_0 : i32, i32
  }
  func.func @transform_2(%arg0: i32) -> (i32, i32) {
    %c0_i32 = arith.constant 0 : i32
    %c0_i32_0 = arith.constant 0 : i32
    %c0_i32_1 = arith.constant 0 : i32
    return %c0_i32, %c0_i32_0 : i32, i32
  }
  func.func @transform_3(%arg0: i32) -> (i32, i32) {
    %c0_i32 = arith.constant 0 : i32
    %c0_i32_0 = arith.constant 0 : i32
    %c0_i32_1 = arith.constant 0 : i32
    return %c0_i32, %c0_i32_0 : i32, i32
  }
  func.func @transform_4(%arg0: i32) -> (i32, i32) {
    %c0_i32 = arith.constant 0 : i32
    %c0_i32_0 = arith.constant 0 : i32
    %c0_i32_1 = arith.constant 0 : i32
    return %c0_i32, %c0_i32_0 : i32, i32
  }
  func.func @transform_5(%arg0: i32) -> (i32, i32) {
    %c0_i32 = arith.constant 0 : i32
    %c0_i32_0 = arith.constant 0 : i32
    %c0_i32_1 = arith.constant 0 : i32
    return %c0_i32, %c0_i32_0 : i32, i32
  }
  func.func @transform_6(%arg0: i32) -> (i32, i32) {
    %c0_i32 = arith.constant 0 : i32
    %c0_i32_0 = arith.constant 0 : i32
    %c0_i32_1 = arith.constant 0 : i32
    return %c0_i32, %c0_i32_0 : i32, i32
  }
  func.func @transform_7(%arg0: i32) -> (i32, i32) {
    %c0_i32 = arith.constant 0 : i32
    %c0_i32_0 = arith.constant 0 : i32
    return %arg0, %c0_i32 : i32, i32
  }
}

</mosaic_0001>

<bundles_post_ra>
// kernel: tpu_custom_call.1
= control target key start
LH: loop header
LB: loop body
LE: loop exit
PB: predicated region body
PF: predicated region fallthrough
CT: control target
= control target key end

     0   :  { %12 = vsyncpa [#allocation3], 0  ;;  %s564_s24 = smov [#allocation2]   ;;  %s737_s0 = inlined_call_operand.vmem [shape: f32[8,8], index: 0, kind: input, shape index: {}]   ;;  %s738_s1 = inlined_call_operand.vmem [shape: f32[8,256], index: 1, kind: input, shape index: {}]   ;;  %s739_s2 = inlined_call_operand.vmem [shape: f32[1,256], index: 2, kind: input, shape index: {}]   ;;  %s740_s3 = inlined_call_operand.hbm [shape: f32[256,256], index: 3, kind: input, shape index: {}]   ;;  %s741_s4 = inlined_call_operand.vmem [shape: f32[1,256], index: 4, kind: input, shape index: {}]   ;;  %s742_s5 = inlined_call_operand.vmem [shape: f32[256,4], index: 5, kind: input, shape index: {}]   ;;  %s743_s6 = inlined_call_operand.vmem [shape: f32[1,4], index: 6, kind: input, shape index: {}]   ;;  %s744_s7 = inlined_call_operand.vmem [shape: f32[8,4], index: 7, kind: output, shape index: {}]  }
   0x1   :  { %s24_s25 = sshll.u32 %s564_s24, 4  ;;  %s540_s28 = scalar_lea.hbm %s740_s3, 8192  ;;  %s25_s25 = int_to_ptr.vmem [resolvable:$true] %s24_s25 }
   0x2   :  { %p541_p0 = scmp.ne.s32.totalorder %s740_s3, %s540_s28  ;;  %p544_p1 = scmp.lt.u32.totalorder %s540_s28, %s740_s3 }
   0x4   :  { %p546_p2 = pnand %p544_p1, %p541_p0 }
   0x6   :  { %549 = shalt.err (!%p546_p2)
}
   0x7   :  { %s550_s10 = scalar_lea.vmem %s25_s25, 8192  ;;  %p555_p4 = scmp.lt.s32.totalorder %s25_s25, %s25_s25 }
   0x8   :  { %p551_p3 = scmp.ne.s32.totalorder %s25_s25, %s550_s10  ;;  %p556_p5 = scmp.lt.s32.totalorder %s550_s10, %s550_s10 }
   0xa   :  { %p557_p6 = por %p556_p5, %p555_p4 }
   0xc   :  { %p558_p7 = pnand %p557_p6, %p551_p3 }
   0xe   :  { %561 = shalt.err (!%p558_p7)
}
   0xf   :  { %s565_s11 = smov 256   ;;  %s566_s12 = smov 16  }
  0x10   :  { %30 = dma.hbm_to_vmem [thread:$0]  %s740_s3, 8192, %s25_s25, [#allocation3], %s565_s11, %s565_s11, %s566_s12  }
  0x11   :  { %562 = dma.done.wait [#allocation3], 8192  }
  0x12   :  { %563 = vsyncadd [#allocation3], 4294959104  ;;  %v567_v0 = vmov 0.0   ;;  %v42_v1 = vld [vmem:[%s738_s1 + $0x8] sm:$0xff]  ;;  %v41_v2 = vld [vmem:[%s738_s1] sm:$0xff]  ;;  %vm55_vm0 = vcmask 64512  }
  0x13   :  { %123 = vmatprep.mubr.f32.mxu0 %v567_v0  ;;  %v40_v3 = vld [vmem:[%s737_s0] sm:$0xff]  ;;  %59 = vmatprep.subr.mxu0 %v42_v1  ;;  %v133_v4 = vld [vmem:[#allocation2 + $0x8] sm:$0xff]  ;;  %v135_v5 = vld [vmem:[#allocation2 + $0x18] sm:$0xff]  ;;  %vm396_vm2 = vcmask 31744  }
  0x14   :  { %v132_v6 = vld [vmem:[#allocation2] sm:$0xff]  ;;  %60 = vmatpush1.msra.mxu0 %v41_v2  ;;  %v440_v7 = vpack.c.bf16 %v135_v5, %v133_v4  ;;  %v134_v8 = vld [vmem:[#allocation2 + $0x10] sm:$0xff]  ;;  %v137_v9 = vld [vmem:[#allocation2 + $0x28] sm:$0xff] }
  0x15   :  { %v139_v10 = vld [vmem:[#allocation2 + $0x38] sm:$0xff]  ;;  %403 = vmatmul.mubr.msk.f32.vlgmr.msra.gmra.mrb[0].mxu0 %vm55_vm0, %v40_v3  ;;  %v442_v11 = vpack.c.bf16 %v134_v8, %v132_v6  ;;  %v136_v13 = vld [vmem:[#allocation2 + $0x20] sm:$0xff]  ;;  %v138_v14 = vld [vmem:[#allocation2 + $0x30] sm:$0xff] }
  0x16   :  { %v444_v12 = vpack.c.bf16 %v139_v10, %v137_v9  ;;  %v141_v15 = vld [vmem:[#allocation2 + $0x48] sm:$0xff]  ;;  %441 = vmatprep.subr.bf16.mxu1 %v440_v7  ;;  %v143_v16 = vld [vmem:[#allocation2 + $0x58] sm:$0xff]  ;;  %v446_v17 = vpack.c.bf16 %v138_v14, %v136_v13  ;;  %v140_v19 = vld [vmem:[#allocation2 + $0x40] sm:$0xff] }
  0x17   :  { %443 = vmatpush1.bf16.msra.mxu1 %v442_v11  ;;  %v448_v18 = vpack.c.bf16 %v143_v16, %v141_v15  ;;  %v142_v20 = vld [vmem:[#allocation2 + $0x50] sm:$0xff]  ;;  %v145_v21 = vld [vmem:[#allocation2 + $0x68] sm:$0xff]  ;;  %v147_v22 = vld [vmem:[#allocation2 + $0x78] sm:$0xff] }
  0x18   :  { %445 = vmatprep.subr.bf16.mxu1 %v444_v12  ;;  %v450_v23 = vpack.c.bf16 %v142_v20, %v140_v19  ;;  %v452_v24 = vpack.c.bf16 %v147_v22, %v145_v21  ;;  %v144_v25 = vld [vmem:[#allocation2 + $0x60] sm:$0xff]  ;;  %v146_v26 = vld [vmem:[#allocation2 + $0x70] sm:$0xff]  ;;  %v149_v27 = vld [vmem:[#allocation2 + $0x88] sm:$0xff] }
  0x19   :  { %v151_v28 = vld [vmem:[#allocation2 + $0x98] sm:$0xff]  ;;  %v454_v29 = vpack.c.bf16 %v146_v26, %v144_v25  ;;  %v148_v31 = vld [vmem:[#allocation2 + $0x80] sm:$0xff]  ;;  %v150_v32 = vld [vmem:[#allocation2 + $0x90] sm:$0xff] }
  0x1a   :  { %v456_v30 = vpack.c.bf16 %v151_v28, %v149_v27  ;;  %v153_v33 = vld [vmem:[#allocation2 + $0xa8] sm:$0xff]  ;;  %v155_v34 = vld [vmem:[#allocation2 + $0xb8] sm:$0xff]  ;;  %v458_v35 = vpack.c.bf16 %v150_v32, %v148_v31  ;;  %v152_v37 = vld [vmem:[#allocation2 + $0xa0] sm:$0xff] }
  0x1b   :  { %447 = vmatpush1.bf16.msra.mxu1 %v446_v17  ;;  %v460_v36 = vpack.c.bf16 %v155_v34, %v153_v33  ;;  %v154_v38 = vld [vmem:[#allocation2 + $0xb0] sm:$0xff]  ;;  %v157_v39 = vld [vmem:[#allocation2 + $0xc8] sm:$0xff]  ;;  %v159_v40 = vld [vmem:[#allocation2 + $0xd8] sm:$0xff] }
  0x1c   :  { %449 = vmatprep.subr.bf16.mxu1 %v448_v18  ;;  %v462_v41 = vpack.c.bf16 %v154_v38, %v152_v37  ;;  %v464_v42 = vpack.c.bf16 %v159_v40, %v157_v39  ;;  %v156_v43 = vld [vmem:[#allocation2 + $0xc0] sm:$0xff]  ;;  %v158_v44 = vld [vmem:[#allocation2 + $0xd0] sm:$0xff]  ;;  %v161_v45 = vld [vmem:[#allocation2 + $0xe8] sm:$0xff] }
  0x1d   :  { %v163_v46 = vld [vmem:[#allocation2 + $0xf8] sm:$0xff]  ;;  %v466_v47 = vpack.c.bf16 %v158_v44, %v156_v43  ;;  %v160_v49 = vld [vmem:[#allocation2 + $0xe0] sm:$0xff]  ;;  %v162_v50 = vld [vmem:[#allocation2 + $0xf0] sm:$0xff] }
  0x1e   :  { %v468_v48 = vpack.c.bf16 %v163_v46, %v161_v45  ;;  %v165_v51 = vld [vmem:[#allocation2 + $0x108] sm:$0xff]  ;;  %v167_v52 = vld [vmem:[#allocation2 + $0x118] sm:$0xff]  ;;  %v470_v53 = vpack.c.bf16 %v162_v50, %v160_v49  ;;  %v164_v55 = vld [vmem:[#allocation2 + $0x100] sm:$0xff] }
  0x1f   :  { %451 = vmatpush1.bf16.msra.mxu1 %v450_v23  ;;  %v472_v54 = vpack.c.bf16 %v167_v52, %v165_v51  ;;  %v166_v56 = vld [vmem:[#allocation2 + $0x110] sm:$0xff]  ;;  %v169_v57 = vld [vmem:[#allocation2 + $0x128] sm:$0xff]  ;;  %v171_v58 = vld [vmem:[#allocation2 + $0x138] sm:$0xff] }
  0x20   :  { %453 = vmatprep.subr.bf16.mxu1 %v452_v24  ;;  %v474_v59 = vpack.c.bf16 %v166_v56, %v164_v55  ;;  %v476_v60 = vpack.c.bf16 %v171_v58, %v169_v57  ;;  %v168_v61 = vld [vmem:[#allocation2 + $0x120] sm:$0xff]  ;;  %v170_v62 = vld [vmem:[#allocation2 + $0x130] sm:$0xff]  ;;  %v173_v63 = vld [vmem:[#allocation2 + $0x148] sm:$0xff] }
  0x21   :  { %v175_v0 = vld [vmem:[#allocation2 + $0x158] sm:$0xff]  ;;  %v478_v1 = vpack.c.bf16 %v170_v62, %v168_v61  ;;  %v172_v3 = vld [vmem:[#allocation2 + $0x140] sm:$0xff]  ;;  %v174_v4 = vld [vmem:[#allocation2 + $0x150] sm:$0xff] }
  0x22   :  { %v480_v2 = vpack.c.bf16 %v175_v0, %v173_v63  ;;  %v177_v5 = vld [vmem:[#allocation2 + $0x168] sm:$0xff]  ;;  %v179_v6 = vld [vmem:[#allocation2 + $0x178] sm:$0xff]  ;;  %v482_v7 = vpack.c.bf16 %v174_v4, %v172_v3  ;;  %v176_v9 = vld [vmem:[#allocation2 + $0x160] sm:$0xff] }
  0x23   :  { %455 = vmatpush1.bf16.msra.mxu1 %v454_v29  ;;  %v484_v8 = vpack.c.bf16 %v179_v6, %v177_v5  ;;  %v178_v10 = vld [vmem:[#allocation2 + $0x170] sm:$0xff]  ;;  %v181_v11 = vld [vmem:[#allocation2 + $0x188] sm:$0xff]  ;;  %v183_v12 = vld [vmem:[#allocation2 + $0x198] sm:$0xff] }
  0x24   :  { %457 = vmatprep.subr.bf16.mxu1 %v456_v30  ;;  %v486_v13 = vpack.c.bf16 %v178_v10, %v176_v9  ;;  %v488_v14 = vpack.c.bf16 %v183_v12, %v181_v11  ;;  %v180_v15 = vld [vmem:[#allocation2 + $0x180] sm:$0xff]  ;;  %v182_v16 = vld [vmem:[#allocation2 + $0x190] sm:$0xff]  ;;  %v185_v17 = vld [vmem:[#allocation2 + $0x1a8] sm:$0xff]  ;;  %v45_v11 = vlaneseq }
  0x25   :  { %v187_v18 = vld [vmem:[#allocation2 + $0x1b8] sm:$0xff]  ;;  %v490_v19 = vpack.c.bf16 %v182_v16, %v180_v15  ;;  %v184_v21 = vld [vmem:[#allocation2 + $0x1a0] sm:$0xff]  ;;  %v186_v22 = vld [vmem:[#allocation2 + $0x1b0] sm:$0xff] }
  0x26   :  { %v492_v20 = vpack.c.bf16 %v187_v18, %v185_v17  ;;  %v189_v23 = vld [vmem:[#allocation2 + $0x1c8] sm:$0xff]  ;;  %v191_v24 = vld [vmem:[#allocation2 + $0x1d8] sm:$0xff]  ;;  %v494_v25 = vpack.c.bf16 %v186_v22, %v184_v21  ;;  %v188_v27 = vld [vmem:[#allocation2 + $0x1c0] sm:$0xff]  ;;  %v46_v12 = vshrl.u32 %v45_v11, 7 }
  0x27   :  { %459 = vmatpush1.bf16.msra.mxu1 %v458_v35  ;;  %v496_v26 = vpack.c.bf16 %v191_v24, %v189_v23  ;;  %v190_v28 = vld [vmem:[#allocation2 + $0x1d0] sm:$0xff]  ;;  %v193_v30 = vld [vmem:[#allocation2 + $0x1e8] sm:$0xff]  ;;  %v195_v31 = vld [vmem:[#allocation2 + $0x1f8] sm:$0xff] }
  0x28   :  { %461 = vmatprep.subr.bf16.mxu1 %v460_v36  ;;  %v498_v29 = vpack.c.bf16 %v190_v28, %v188_v27  ;;  %v500_v32 = vpack.c.bf16 %v195_v31, %v193_v30  ;;  %v192_v33 = vld [vmem:[#allocation2 + $0x1e0] sm:$0xff]  ;;  %v194_v34 = vld [vmem:[#allocation2 + $0x1f0] sm:$0xff]  ;;  %v298_v37 = vld [vmem:[%s742_s5 + $0x88] sm:$0xff]  ;;  %v51_v15 = vsub.s32 1, %v46_v12 }
  0x29   :  { %v502_v35 = vpack.c.bf16 %v194_v34, %v192_v33  ;;  %v297_v36 = vld [vmem:[%s742_s5 + $0x80] sm:$0xff]  ;;  %v282_v40 = vld [vmem:[%s742_s5 + $0x8] sm:$0xff]  ;;  %v283_v45 = vld [vmem:[%s742_s5 + $0x10] sm:$0xff] }
  0x2a   :  { %v281_v38 = vld [vmem:[%s742_s5] sm:$0xff]  ;;  %v504_v39 = vpack.c.bf16 %v298_v37, %v297_v36  ;;  %v284_v46 = vld [vmem:[%s742_s5 + $0x18] sm:$0xff]  ;;  %v286_v52 = vld [vmem:[%s742_s5 + $0x28] sm:$0xff] }
  0x2b   :  { %463 = vmatpush1.bf16.msra.mxu1 %v462_v41  ;;  %v299_v41 = vld [vmem:[%s742_s5 + $0x90] sm:$0xff]  ;;  %v506_v43 = vpack.c.bf16 %v282_v40, %v281_v38  ;;  %v510_v49 = vpack.c.bf16 %v284_v46, %v283_v45  ;;  %v285_v51 = vld [vmem:[%s742_s5 + $0x20] sm:$0xff]  ;;  %v288_v58 = vld [vmem:[%s742_s5 + $0x38] sm:$0xff]  ;;  %v391_v46 = vand.u32 127, %v45_v11 }
  0x2c   :  { %465 = vmatprep.subr.bf16.mxu1 %v464_v42  ;;  %v300_v42 = vld [vmem:[%s742_s5 + $0x98] sm:$0xff]  ;;  %505 = vmatprep.subr.bf16.mxu0 %v504_v39  ;;  %v514_v55 = vpack.c.bf16 %v286_v52, %v285_v51  ;;  %v287_v57 = vld [vmem:[%s742_s5 + $0x30] sm:$0xff]  ;;  %v289_v63 = vld [vmem:[%s742_s5 + $0x40] sm:$0xff] }
  0x2d   :  { %v508_v44 = vpack.c.bf16 %v300_v42, %v299_v41  ;;  %507 = vmatpush3.bf16.msra.mxu0 %v506_v43  ;;  %v518_v61 = vpack.c.bf16 %v288_v58, %v287_v57  ;;  %v290_v0 = vld [vmem:[%s742_s5 + $0x48] sm:$0xff]  ;;  %v291_v5 = vld [vmem:[%s742_s5 + $0x50] sm:$0xff]  ;;  %v292_v6 = vld [vmem:[%s742_s5 + $0x58] sm:$0xff]  ;;  %vm394_vm1 = vcmp.ge.s32.totalorder %v391_v46, 2 }
  0x2e   :  { %v522_v3 = vpack.c.bf16 %v290_v0, %v289_v63  ;;  %v526_v9 = vpack.c.bf16 %v292_v6, %v291_v5  ;;  %v293_v24 = vld [vmem:[%s742_s5 + $0x60] sm:$0xff]  ;;  %v311_v27 = vld [vmem:[%s742_s5 + $0xf0] sm:$0xff]  ;;  %v312_v28 = vld [vmem:[%s742_s5 + $0xf8] sm:$0xff] }
  0x2f   :  { %467 = vmatpush1.bf16.msra.mxu1 %v466_v47  ;;  %v301_v47 = vld [vmem:[%s742_s5 + $0xa0] sm:$0xff]  ;;  %509 = vmatprep.subr.bf16.mxu0 %v508_v44  ;;  %v295_v30 = vld [vmem:[%s742_s5 + $0x70] sm:$0xff]  ;;  %v296_v31 = vld [vmem:[%s742_s5 + $0x78] sm:$0xff] }
  0x30   :  { %469 = vmatprep.subr.bf16.mxu1 %v468_v48  ;;  %v302_v48 = vld [vmem:[%s742_s5 + $0xa8] sm:$0xff]  ;;  %v196_v33 = vld [vmem:[%s741_s4] sm:$0x3] }
  0x31   :  { %v512_v50 = vpack.c.bf16 %v302_v48, %v301_v47  ;;  %511 = vmatpush3.bf16.msra.mxu0 %v510_v49  ;;  %v404_v43 = vld [vmem:[%s743_s6] ss:$0 sm:$0xff] }
  0x33   :  { %471 = vmatpush1.bf16.msra.mxu1 %v470_v53  ;;  %v303_v53 = vld [vmem:[%s742_s5 + $0xb0] sm:$0xff]  ;;  %513 = vmatprep.subr.bf16.mxu0 %v512_v50 }
  0x34   :  { %473 = vmatprep.subr.bf16.mxu1 %v472_v54  ;;  %v304_v54 = vld [vmem:[%s742_s5 + $0xb8] sm:$0xff] }
  0x35   :  { %v516_v56 = vpack.c.bf16 %v304_v54, %v303_v53  ;;  %515 = vmatpush3.bf16.msra.mxu0 %v514_v55 }
  0x37   :  { %475 = vmatpush1.bf16.msra.mxu1 %v474_v59  ;;  %v305_v59 = vld [vmem:[%s742_s5 + $0xc0] sm:$0xff]  ;;  %517 = vmatprep.subr.bf16.mxu0 %v516_v56 }
  0x38   :  { %477 = vmatprep.subr.bf16.mxu1 %v476_v60  ;;  %v306_v60 = vld [vmem:[%s742_s5 + $0xc8] sm:$0xff] }
  0x39   :  { %v520_v62 = vpack.c.bf16 %v306_v60, %v305_v59  ;;  %519 = vmatpush3.bf16.msra.mxu0 %v518_v61 }
  0x3b   :  { %479 = vmatpush1.bf16.msra.mxu1 %v478_v1  ;;  %v307_v1 = vld [vmem:[%s742_s5 + $0xd0] sm:$0xff]  ;;  %521 = vmatprep.subr.bf16.mxu0 %v520_v62 }
  0x3c   :  { %481 = vmatprep.subr.bf16.mxu1 %v480_v2  ;;  %v308_v2 = vld [vmem:[%s742_s5 + $0xd8] sm:$0xff] }
  0x3d   :  { %v524_v4 = vpack.c.bf16 %v308_v2, %v307_v1  ;;  %523 = vmatpush3.bf16.msra.mxu0 %v522_v3 }
  0x3f   :  { %483 = vmatpush1.bf16.msra.mxu1 %v482_v7  ;;  %v309_v7 = vld [vmem:[%s742_s5 + $0xe0] sm:$0xff]  ;;  %525 = vmatprep.subr.bf16.mxu0 %v524_v4 }
  0x40   :  { %485 = vmatprep.subr.bf16.mxu1 %v484_v8  ;;  %v310_v8 = vld [vmem:[%s742_s5 + $0xe8] sm:$0xff] }
  0x41   :  { %v528_v10 = vpack.c.bf16 %v310_v8, %v309_v7  ;;  %527 = vmatpush3.bf16.msra.mxu0 %v526_v9 }
  0x43   :  { %487 = vmatpush1.bf16.msra.mxu1 %v486_v13  ;;  %529 = vmatprep.subr.bf16.mxu0 %v528_v10  ;;  %v47_v13 = vsub.s32 0, %v46_v12 }
  0x44   :  { %489 = vmatprep.subr.bf16.mxu1 %v488_v14  ;;  %v43_v14 = vld [vmem:[%s739_s2] sm:$0x3] }
  0x45   :  { %v48_v16 = vrot.slane %v43_v14, %v47_v13  ;;  %v52_v17 = vrot.slane %v43_v14, %v51_v15  ;;  %v201_v34 = vrot.slane %v196_v33, %v47_v13 }
  0x47   :  { %491 = vmatpush1.bf16.msra.mxu1 %v490_v19 }
  0x48   :  { %493 = vmatprep.subr.bf16.mxu1 %v492_v20 }
  0x4b   :  { %495 = vmatpush1.bf16.msra.mxu1 %v494_v25  ;;  %v294_v25 = vld [vmem:[%s742_s5 + $0x68] sm:$0xff] }
  0x4c   :  { %497 = vmatprep.subr.bf16.mxu1 %v496_v26  ;;  %v530_v26 = vpack.c.bf16 %v294_v25, %v293_v24 }
  0x4e   :  { %531 = vmatpush3.bf16.msra.mxu0 %v530_v26 }
  0x4f   :  { %499 = vmatpush1.bf16.msra.mxu1 %v498_v29  ;;  %v532_v29 = vpack.c.bf16 %v312_v28, %v311_v27 }
  0x50   :  { %501 = vmatprep.subr.bf16.mxu1 %v500_v32  ;;  %v534_v32 = vpack.c.bf16 %v296_v31, %v295_v30 }
  0x51   :  { %533 = vmatprep.subr.bf16.mxu0 %v532_v29 }
  0x52   :  { %535 = vmatpush3.bf16.msra.mxu0 %v534_v32 }
  0x53   :  { %503 = vmatpush1.bf16.msra.mxu1 %v502_v35  ;;  %v205_v35 = vrot.slane %v196_v33, %v51_v15 }
  0xe8   :  { %v125_v18 = vpop.f32.mrb[0].mxu0 }
  0xe9   :  { %v126_v19 = vadd.f32 %v125_v18, %v48_v16  ;;  %v127_v20 = vpop.f32.mrb[1].mxu0 }
  0xea   :  { %v128_v21 = vadd.f32 %v127_v20, %v52_v17 }
  0xeb   :  { %v130_v23 = vmax.f32 %v126_v19, 0.0 }
  0xec   :  { %v131_v22 = vmax.f32 %v128_v21, 0.0 }
  0xee   :  { %272 = vmatprep.mubr.f32.mxu1 %v131_v22 }
  0xef   :  { %273 = vmatmul.mubr.f32.vlgmr.msra.gmra.mrb[0].mxu1 %v130_v23 }
 0x1c2   :  { %v274_v36 = vpop.f32.mrb[0].mxu1 }
 0x1c3   :  { %v275_v37 = vadd.f32 %v274_v36, %v201_v34  ;;  %v276_v38 = vpop.f32.mrb[1].mxu1 }
 0x1c4   :  { %v277_v39 = vadd.f32 %v276_v38, %v205_v35 }
 0x1c5   :  { %v279_v41 = vmax.f32 %v275_v37, 0.0 }
 0x1c6   :  { %v280_v40 = vmax.f32 %v277_v39, 0.0 }
 0x1c8   :  { %384 = vmatprep.mubr.f32.mxu0 %v280_v40 }
 0x1c9   :  { %385 = vmatmul.mubr.f32.vlgmr.msra.gmra.mrb[2].mxu0 %v279_v41 }
 0x29c   :  { %v437_v42 = vpop.f32.mrb[2].mxu0 }
 0x29d   :  { %v438_v44 = vpop.f32.mrb[3].mxu0 }
 0x29e   :  { %v439_v45 = vadd.f32 %v438_v44, %v437_v42 }
 0x2a0   :  { %v387_v47 = vadd.f32 %v439_v45, %v404_v43 }
 0x2a2   :  { %v392_v48 = vmax.f32 %v387_v47, 1e-06 }
 0x2a4   :  { %v393_v49 = vmin.f32 %v392_v48, 1.0 }
 0x2a6   :  { %v395_v50 = vsel %vm394_vm1, %v393_v49, %v387_v47 }
 0x2a7   :  { %397 = vst.msk [vmem:[%s744_s7] sm:$0xff] %vm396_vm2, %v395_v50 }
 0x2a8   :  { %402 = vsyncpa [#allocation3], 1 }

</bundles_post_ra>
